<compile_context>
chip_gen: v7x
topology: tpu7x:2x2x1
jax: 0.10.0
libtpu: 0.0.40
codegen_flags: <defaults>
</compile_context>

<pallas_src>
import functools
import math

import jax
import jax.numpy as jnp
from jax.experimental import pallas as pl
from jax.experimental.pallas import tpu as pltpu


_VMEM_LIMIT = 40 * 1024 * 1024   # < v7x 64 MiB physical; > v5e 16 MiB scoped default


def _cparams(dims):
    return pltpu.CompilerParams(dimension_semantics=dims,
                                vmem_limit_bytes=_VMEM_LIMIT)


def _pick_tile(dim, target, align):
    """Largest tile <= target that divides `dim` and respects `align`,
    falling back to the full dimension (always legal per the (8,128) rule)."""
    if dim <= target:
        return dim
    t = (target // align) * align
    while t >= align:
        if dim % t == 0:
            return t
        t -= align
    return dim


# ---------------------------------------------------------------------------
# QKV projection with head-split epilogue: x @ W + b -> (H, M, dh) per output.
# Full-width matmul (full K, full N) keeps the MXU wide; the per-head slice
# stores do the "split heads" relayout inside the epilogue (no HBM transpose).
# ---------------------------------------------------------------------------

def _proj_split_heads_kernel(x_ref, w_ref, b_ref, *o_refs, num_heads, emb):
    y = jnp.dot(x_ref[...].astype(jnp.bfloat16), w_ref[...],
                preferred_element_type=jnp.float32)
    y = (y + b_ref[...].astype(jnp.float32)).astype(o_refs[0].dtype)
    dh = emb // num_heads
    for t, o_ref in enumerate(o_refs):
        base = t * emb
        for h in range(num_heads):
            o_ref[h] = y[:, base + h * dh: base + (h + 1) * dh]


def pallas_project_heads(x, w, b, *, num_heads, tm=256):
    """x:(M,E) @ w:(E, n_out*E) + b.  Returns n_out arrays of shape (H, M, dh)."""
    M, E = x.shape
    N = w.shape[1]
    n_out = N // E
    dh = E // num_heads
    tm = _pick_tile(M, tm, 16)
    kernel = functools.partial(_proj_split_heads_kernel,
                               num_heads=num_heads, emb=E)
    out_shape = tuple(jax.ShapeDtypeStruct((num_heads, M, dh), jnp.bfloat16)
                      for _ in range(n_out))
    out_specs = tuple(pl.BlockSpec((num_heads, tm, dh), lambda i: (0, i, 0))
                      for _ in range(n_out))
    return pl.pallas_call(
        kernel,
        out_shape=out_shape,
        grid=(M // tm,),
        in_specs=[pl.BlockSpec((tm, E), lambda i: (i, 0)),
                  pl.BlockSpec((E, N), lambda i: (0, 0)),     # weight resident
                  pl.BlockSpec((1, N), lambda i: (0, 0))],
        out_specs=out_specs,
        compiler_params=_cparams(("parallel",)),
    )(x, w, b.reshape(1, N))


# ---------------------------------------------------------------------------
# Flash attention over head-major (H, B*S, dh) tensors.
# grid = (B, H, q-tiles, kv-tiles); kv is the (arbitrary) reduction axis.
# ---------------------------------------------------------------------------

def _flash_attn_kernel(q_ref, k_ref, v_ref, o_ref, m_sc, l_sc, acc_sc, *, scale):
    ki = pl.program_id(3)

    @pl.when(ki == 0)
    def _():
        m_sc[...] = jnp.full_like(m_sc, -jnp.inf)
        l_sc[...] = jnp.zeros_like(l_sc)
        acc_sc[...] = jnp.zeros_like(acc_sc)

    q = q_ref[0]                                  # (tq, dh) bf16
    k = k_ref[0]                                  # (tkv, dh) bf16
    s = jax.lax.dot_general(q, k, (((1,), (1,)), ((), ())),
                            preferred_element_type=jnp.float32) * scale
    m_prev = m_sc[...]
    m_new = jnp.maximum(m_prev, jnp.max(s, axis=-1, keepdims=True))
    alpha = jnp.exp(m_prev - m_new)
    p = jnp.exp(s - m_new)
    l_sc[...] = alpha * l_sc[...] + jnp.sum(p, axis=-1, keepdims=True)
    acc_sc[...] = alpha * acc_sc[...] + jnp.dot(
        p.astype(v_ref.dtype), v_ref[0], preferred_element_type=jnp.float32)
    m_sc[...] = m_new

    @pl.when(ki == pl.num_programs(3) - 1)
    def _():
        o_ref[0] = (acc_sc[...] / l_sc[...]).astype(o_ref.dtype)   # exact div


def pallas_flash_attention(q_hm, k_hm, v_hm, *, batch, seq, tq=256, tkv=512):
    """q/k/v: (H, B*S, dh) head-major.  Returns (H, B*S, dh)."""
    H, M, dh = q_hm.shape
    tq = _pick_tile(seq, tq, 16)
    tkv = _pick_tile(seq, tkv, 16)
    nq = seq // tq
    nkv = seq // tkv
    kernel = functools.partial(_flash_attn_kernel, scale=1.0 / math.sqrt(dh))
    q_spec = pl.BlockSpec((1, tq, dh), lambda b, h, qi, ki: (h, b * nq + qi, 0))
    kv_spec = pl.BlockSpec((1, tkv, dh), lambda b, h, qi, ki: (h, b * nkv + ki, 0))
    o_spec = pl.BlockSpec((1, tq, dh), lambda b, h, qi, ki: (h, b * nq + qi, 0))
    return pl.pallas_call(
        kernel,
        out_shape=jax.ShapeDtypeStruct((H, M, dh), q_hm.dtype),
        grid=(batch, H, nq, nkv),
        in_specs=[q_spec, kv_spec, kv_spec],
        out_specs=o_spec,
        scratch_shapes=[pltpu.VMEM((tq, 1), jnp.float32),
                        pltpu.VMEM((tq, 1), jnp.float32),
                        pltpu.VMEM((tq, dh), jnp.float32)],
        compiler_params=_cparams(("parallel", "parallel", "parallel", "arbitrary")),
    )(q_hm, k_hm, v_hm)


# ---------------------------------------------------------------------------
# Fused: per-head Wo contraction (accumulated over heads) + query @ sum(Theta_i)
#        + bias + residual (f32 query) + LayerNorm.
# Consumes head-major attention output (H, M, dh) directly.
# ---------------------------------------------------------------------------

def _msa_ln_kernel(attn_ref, q_ref, wo_ref, waug_ref, bo_ref, g_ref, bt_ref,
                   o_ref, acc_ref, *, eps):
    h = pl.program_id(1)

    @pl.when(h == 0)
    def _():
        acc_ref[...] = (jnp.dot(q_ref[...].astype(jnp.bfloat16), waug_ref[...],
                                preferred_element_type=jnp.float32)
                        + bo_ref[...].astype(jnp.float32))

    acc_ref[...] += jnp.dot(attn_ref[0].astype(jnp.bfloat16), wo_ref[0],
                            preferred_element_type=jnp.float32)

    @pl.when(h == pl.num_programs(1) - 1)
    def _():
        x = q_ref[...].astype(jnp.float32) + acc_ref[...]     # f32 residual
        mu = jnp.mean(x, axis=-1, keepdims=True)
        var = jnp.mean(jnp.square(x - mu), axis=-1, keepdims=True)
        xn = (x - mu) * jax.lax.rsqrt(var + eps)
        o_ref[...] = (xn * g_ref[...].astype(jnp.float32)
                      + bt_ref[...].astype(jnp.float32)).astype(o_ref.dtype)


def pallas_msa_ln(attn_hm, q_res, wo_heads, waug, bo, gamma, beta, *,
                  eps=1e-5, out_dtype=None, tm=512):
    H, M, dh = attn_hm.shape
    E = waug.shape[0]
    out_dtype = out_dtype or q_res.dtype
    tm = _pick_tile(M, tm, 16)
    kernel = functools.partial(_msa_ln_kernel, eps=eps)
    vec = pl.BlockSpec((1, E), lambda i, h: (0, 0))
    return pl.pallas_call(
        kernel,
        out_shape=jax.ShapeDtypeStruct((M, E), out_dtype),
        grid=(M // tm, H),
        in_specs=[pl.BlockSpec((1, tm, dh), lambda i, h: (h, i, 0)),
                  pl.BlockSpec((tm, E), lambda i, h: (i, 0)),    # resident over h
                  pl.BlockSpec((1, dh, E), lambda i, h: (h, 0, 0)),
                  pl.BlockSpec((E, E), lambda i, h: (0, 0)),
                  vec, vec, vec],
        out_specs=pl.BlockSpec((tm, E), lambda i, h: (i, 0)),
        scratch_shapes=[pltpu.VMEM((tm, E), jnp.float32)],
        compiler_params=_cparams(("parallel", "arbitrary")),
    )(attn_hm, q_res, wo_heads, waug, bo.reshape(1, E),
      gamma.reshape(1, E), beta.reshape(1, E))


# ---------------------------------------------------------------------------
# Full-K matmul: y = act(x @ w + b)  (used for FFN1; K = E fits in one tile).
# x row tile is resident across the N axis; w is fully resident when tn == N.
# ---------------------------------------------------------------------------

def _matmul_bias_act_kernel(x_ref, w_ref, b_ref, o_ref, *, activation):
    y = jnp.dot(x_ref[...].astype(jnp.bfloat16), w_ref[...],
                preferred_element_type=jnp.float32)
    y = y + b_ref[...].astype(jnp.float32)
    if activation == "gelu":
        # tanh-approximate GELU, computed in f32 (v5e VPU/EUP have no bf16)
        c = math.sqrt(2.0 / math.pi)
        y = 0.5 * y * (1.0 + jnp.tanh(c * (y + 0.044715 * y * y * y)))
    o_ref[...] = y.astype(o_ref.dtype)


def pallas_matmul(x, w, b, activation=None, out_dtype=None, tm=256, tn=4096):
    M, K = x.shape
    N = w.shape[1]
    out_dtype = out_dtype or x.dtype
    tm = _pick_tile(M, tm, 16)
    tn = _pick_tile(N, tn, 256)
    kernel = functools.partial(_matmul_bias_act_kernel, activation=activation)
    return pl.pallas_call(
        kernel,
        out_shape=jax.ShapeDtypeStruct((M, N), out_dtype),
        grid=(M // tm, N // tn),
        in_specs=[pl.BlockSpec((tm, K), lambda i, j: (i, 0)),   # resident over j
                  pl.BlockSpec((K, tn), lambda i, j: (0, j)),
                  pl.BlockSpec((1, tn), lambda i, j: (0, j))],
        out_specs=pl.BlockSpec((tm, tn), lambda i, j: (i, j)),
        compiler_params=_cparams(("parallel", "parallel")),
    )(x, w, b.reshape(1, N))


# ---------------------------------------------------------------------------
# Fused: f1 @ W2 + b2, residual add (h1), LayerNorm.  K tiled (full by default).
# ---------------------------------------------------------------------------

def _ffn2_ln_kernel(f1_ref, w2_ref, h1_ref, b_ref, g_ref, bt_ref, o_ref,
                    acc_ref, *, eps):
    k = pl.program_id(1)

    @pl.when(k == 0)
    def _():
        acc_ref[...] = jnp.zeros_like(acc_ref)

    acc_ref[...] += jnp.dot(f1_ref[...].astype(jnp.bfloat16), w2_ref[...],
                            preferred_element_type=jnp.float32)

    @pl.when(k == pl.num_programs(1) - 1)
    def _():
        x = (h1_ref[...].astype(jnp.float32) + acc_ref[...]
             + b_ref[...].astype(jnp.float32))
        mu = jnp.mean(x, axis=-1, keepdims=True)
        var = jnp.mean(jnp.square(x - mu), axis=-1, keepdims=True)
        xn = (x - mu) * jax.lax.rsqrt(var + eps)
        o_ref[...] = (xn * g_ref[...].astype(jnp.float32)
                      + bt_ref[...].astype(jnp.float32)).astype(o_ref.dtype)


def pallas_ffn2_ln(f1, w2, h1, b2, gamma, beta, *, eps=1e-5, out_dtype=None,
                   tm=512, tk=4096):
    M, K = f1.shape
    E = w2.shape[1]
    out_dtype = out_dtype or h1.dtype
    tm = _pick_tile(M, tm, 16)
    tk = _pick_tile(K, tk, 256)
    kernel = functools.partial(_ffn2_ln_kernel, eps=eps)
    vec = pl.BlockSpec((1, E), lambda i, k: (0, 0))
    return pl.pallas_call(
        kernel,
        out_shape=jax.ShapeDtypeStruct((M, E), out_dtype),
        grid=(M // tm, K // tk),
        in_specs=[pl.BlockSpec((tm, tk), lambda i, k: (i, k)),
                  pl.BlockSpec((tk, E), lambda i, k: (k, 0)),
                  pl.BlockSpec((tm, E), lambda i, k: (i, 0)),   # resident over k
                  vec, vec, vec],
        out_specs=pl.BlockSpec((tm, E), lambda i, k: (i, 0)),
        scratch_shapes=[pltpu.VMEM((tm, E), jnp.float32)],
        compiler_params=_cparams(("parallel", "arbitrary")),
    )(f1, w2, h1, b2.reshape(1, E), gamma.reshape(1, E), beta.reshape(1, E))


# ---------------------------------------------------------------------------
# Parameters + forward (glue in plain JAX, all compute in Pallas)
# ---------------------------------------------------------------------------

def init_params(key, emb_size, aug_nums, ffn_mult=4):
    ks = jax.random.split(key, 8)
    s = 1.0 / math.sqrt(emb_size)
    hidden = ffn_mult * emb_size

    def w(k, shape, scale):
        return scale * jax.random.normal(k, shape, jnp.float32)

    return {
        "wq": w(ks[0], (emb_size, emb_size), s), "bq": jnp.zeros((emb_size,), jnp.float32),
        "wk": w(ks[1], (emb_size, emb_size), s), "bk": jnp.zeros((emb_size,), jnp.float32),
        "wv": w(ks[2], (emb_size, emb_size), s), "bv": jnp.zeros((emb_size,), jnp.float32),
        "wo": w(ks[3], (emb_size, emb_size), s), "bo": jnp.zeros((emb_size,), jnp.float32),
        "aug": w(ks[4], (aug_nums, emb_size, emb_size), 0.1 * s),
        "ln1_g": jnp.ones((emb_size,), jnp.float32),
        "ln1_b": jnp.zeros((emb_size,), jnp.float32),
        "w1": w(ks[5], (emb_size, hidden), s), "b1": jnp.zeros((hidden,), jnp.float32),
        "w2": w(ks[6], (hidden, emb_size), 1.0 / math.sqrt(hidden)),
        "b2": jnp.zeros((emb_size,), jnp.float32),
        "ln2_g": jnp.ones((emb_size,), jnp.float32),
        "ln2_b": jnp.zeros((emb_size,), jnp.float32),
    }


def prepare_params(raw, num_heads, compute_dtype=jnp.bfloat16):
    """One-time prep: fold augmented shortcuts (sum_i x@Theta_i == x@sum_i Theta_i),
    concat QKV weights for the self-attention fast path, reshape Wo per head,
    and cast matmul weights to bf16 for the MXU; biases/LN params stay f32."""
    E = raw["wq"].shape[0]
    dh = E // num_heads
    p = {}
    for name in ("wq", "wk", "wv", "w1", "w2"):
        p[name] = raw[name].astype(compute_dtype)
    for name in ("bq", "bk", "bv", "bo", "b1", "b2",
                 "ln1_g", "ln1_b", "ln2_g", "ln2_b"):
        p[name] = raw[name]
    p["wqkv"] = jnp.concatenate([raw["wq"], raw["wk"], raw["wv"]],
                                axis=1).astype(compute_dtype)
    p["bqkv"] = jnp.concatenate([raw["bq"], raw["bk"], raw["bv"]])
    p["wo_heads"] = raw["wo"].reshape(num_heads, dh, E).astype(compute_dtype)
    p["aug_sum"] = jnp.sum(raw["aug"], axis=0).astype(compute_dtype)
    return p


def pangu_transformer_encoder(params, query, key, value, *, num_heads):
    B, S, E = query.shape
    assert E % num_heads == 0
    M = B * S
    out_dtype = query.dtype

    q2d = query.reshape(M, E)           # original dtype; kernels cast to bf16

    if (query is key) and (key is value):
        # Self-attention: fused QKV projection against [wq|wk|wv]
        qh, kh, vh = pallas_project_heads(q2d, params["wqkv"], params["bqkv"],
                                          num_heads=num_heads)
    else:
        k2d = key.reshape(M, E)
        v2d = value.reshape(M, E)
        (qh,) = pallas_project_heads(q2d, params["wq"], params["bq"],
                                     num_heads=num_heads)
        (kh,) = pallas_project_heads(k2d, params["wk"], params["bk"],
                                     num_heads=num_heads)
        (vh,) = pallas_project_heads(v2d, params["wv"], params["bv"],
                                     num_heads=num_heads)

    # Flash attention over head-major (H, M, dh) tensors
    attn = pallas_flash_attention(qh, kh, vh, batch=B, seq=S)

    # Per-head Wo + folded augmented shortcuts + bias + f32 residual + LayerNorm
    h1 = pallas_msa_ln(attn, q2d, params["wo_heads"], params["aug_sum"],
                       params["bo"], params["ln1_g"], params["ln1_b"],
                       out_dtype=jnp.bfloat16)

    # FFN: first matmul with fused GELU (full K, full/near-full N)
    f1 = pallas_matmul(h1, params["w1"], params["b1"],
                       activation="gelu", out_dtype=jnp.bfloat16)

    # Second FFN matmul fused with residual + LayerNorm
    out = pallas_ffn2_ln(f1, params["w2"], h1, params["b2"],
                         params["ln2_g"], params["ln2_b"], out_dtype=out_dtype)
    return out.reshape(B, S, E)


# ---------------------------------------------------------------------------
# Pure-JAX reference (same assumed semantics) for sanity checking
# ---------------------------------------------------------------------------

def _reference_forward(raw, query, key, value, *, num_heads, eps=1e-5):
    B, S, E = query.shape
    H = num_heads
    dh = E // H
    M = B * S
    q2d = query.reshape(M, E)
    k2d = key.reshape(M, E)
    v2d = value.reshape(M, E)
    qp = q2d @ raw["wq"] + raw["bq"]
    kp = k2d @ raw["wk"] + raw["bk"]
    vp = v2d @ raw["wv"] + raw["bv"]

    def split(x):
        return x.reshape(B, S, H, dh).transpose(0, 2, 1, 3)

    s = jnp.einsum("bhqd,bhkd->bhqk", split(qp), split(kp)) / math.sqrt(dh)
    p = jax.nn.softmax(s, axis=-1)
    a = jnp.einsum("bhqk,bhkd->bhqd", p, split(vp))
    a = a.transpose(0, 2, 1, 3).reshape(M, E)
    msa = a @ raw["wo"] + raw["bo"] + jnp.einsum("me,nef->mf", q2d, raw["aug"])

    def ln(x, g, b):
        mu = jnp.mean(x, axis=-1, keepdims=True)
        var = jnp.mean(jnp.square(x - mu), axis=-1, keepdims=True)
        return (x - mu) * jax.lax.rsqrt(var + eps) * g + b

    h1 = ln(q2d + msa, raw["ln1_g"], raw["ln1_b"])
    z = h1 @ raw["w1"] + raw["b1"]
    c = math.sqrt(2.0 / math.pi)
    f1 = 0.5 * z * (1.0 + jnp.tanh(c * (z + 0.044715 * z * z * z)))
    ffn = f1 @ raw["w2"] + raw["b2"]
    out = ln(h1 + ffn, raw["ln2_g"], raw["ln2_b"])
    return out.reshape(B, S, E)


# ---------------------------------------------------------------------------
# Main
# ---------------------------------------------------------------------------

if __name__ == "__main__":
    B, S, E = 2, 8, 32
    AUG_MSA_NUMS = 4          # small-shape stand-in for the default 8 / emb 768

    root = jax.random.PRNGKey(0)
    kp, kq, kk, kv = jax.random.split(root, 4)

    raw = init_params(kp, E, AUG_MSA_NUMS)
    params = prepare_params(raw, num_heads=AUG_MSA_NUMS)
    query = jax.random.normal(kq, (B, S, E), jnp.float32)
    key_in = jax.random.normal(kk, (B, S, E), jnp.float32)
    value = jax.random.normal(kv, (B, S, E), jnp.float32)

    # Cross-attention path (distinct q/k/v -> three separate projections)
    out_cross = jax.block_until_ready(
        pangu_transformer_encoder(params, query, key_in, value,
                                  num_heads=AUG_MSA_NUMS))
    assert out_cross.shape == (B, S, E)
    assert bool(jnp.all(jnp.isfinite(out_cross)))
    ref_cross = _reference_forward(raw, query, key_in, value,
                                   num_heads=AUG_MSA_NUMS)
    assert float(jnp.max(jnp.abs(out_cross - ref_cross))) < 0.2

    # Self-attention path (query is key is value -> fused QKV projection)
    out_self = jax.block_until_ready(
        pangu_transformer_encoder(params, query, query, query,
                                  num_heads=AUG_MSA_NUMS))
    assert bool(jnp.all(jnp.isfinite(out_self)))
    ref_self = _reference_forward(raw, query, query, query,
                                  num_heads=AUG_MSA_NUMS)
    assert float(jnp.max(jnp.abs(out_self - ref_self))) < 0.2

    print("KERNEL_OK")
</pallas_src>

<mosaic_0001>
module attributes {stable_mosaic.version = 11 : i64} {
  func.func @_proj_split_heads_kernel(%arg0: i32, %arg1: memref<16x32xf32, #tpu.memory_space<vmem>>, %arg2: memref<32x32xbf16, #tpu.memory_space<vmem>>, %arg3: memref<1x32xf32, #tpu.memory_space<vmem>>, %arg4: memref<4x16x8xbf16, #tpu.memory_space<vmem>>) attributes {dimension_semantics = [#tpu.dimension_semantics<parallel>], iteration_bounds = array<i64: 1>, scalar_prefetch = 0 : i64, scratch_operands = 0 : i64, tpu.core_type = #tpu.core_type<tc>, window_params = [{transform_indices = @transform_0, window_bounds = array<i64: 16, 32>}, {pipeline_mode = #tpu.pipeline_mode<synchronous>, transform_indices = @transform_1, window_bounds = array<i64: 32, 32>}, {pipeline_mode = #tpu.pipeline_mode<synchronous>, transform_indices = @transform_2, window_bounds = array<i64: 1, 32>}, {transform_indices = @transform_3, window_bounds = array<i64: 4, 16, 8>}]} {
    %c0 = arith.constant 0 : index
    %c0_0 = arith.constant 0 : index
    %0 = vector.load %arg1[%c0, %c0_0] : memref<16x32xf32, #tpu.memory_space<vmem>>, vector<16x32xf32>
    %1 = arith.truncf %0 : vector<16x32xf32> to vector<16x32xbf16>
    %c0_1 = arith.constant 0 : index
    %c0_2 = arith.constant 0 : index
    %2 = vector.load %arg2[%c0_1, %c0_2] : memref<32x32xbf16, #tpu.memory_space<vmem>>, vector<32x32xbf16>
    %cst = arith.constant dense<0.000000e+00> : vector<16x32xf32>
    %3 = tpu.matmul %1, %2, %cst {dimension_numbers = #tpu.dot_dimension_numbers<[1], [0], [0], [1], [0, 0, 1, 1], [], []>} : vector<16x32xbf16>, vector<32x32xbf16>, vector<16x32xf32> -> vector<16x32xf32>
    %c0_3 = arith.constant 0 : index
    %c0_4 = arith.constant 0 : index
    %4 = vector.load %arg3[%c0_3, %c0_4] : memref<1x32xf32, #tpu.memory_space<vmem>>, vector<1x32xf32>
    %5 = vector.broadcast %4 : vector<1x32xf32> to vector<16x32xf32>
    %6 = arith.addf %3, %5 : vector<16x32xf32>
    %7 = arith.truncf %6 : vector<16x32xf32> to vector<16x32xbf16>
    %8 = vector.extract_strided_slice %7 {offsets = [0, 0], sizes = [16, 8], strides = [1, 1]} : vector<16x32xbf16> to vector<16x8xbf16>
    %c0_5 = arith.constant 0 : index
    %c0_6 = arith.constant 0 : index
    %c0_7 = arith.constant 0 : index
    %9 = vector.load %arg4[%c0_5, %c0_6, %c0_7] : memref<4x16x8xbf16, #tpu.memory_space<vmem>>, vector<1x16x8xbf16>
    %10 = vector.shape_cast %9 : vector<1x16x8xbf16> to vector<16x8xbf16>
    %11 = vector.shape_cast %8 : vector<16x8xbf16> to vector<1x16x8xbf16>
    tpu.vector_store %arg4[%c0_5, %c0_6, %c0_7], %11 {strides = array<i32>} : memref<4x16x8xbf16, #tpu.memory_space<vmem>>, vector<1x16x8xbf16>,
    %12 = vector.extract_strided_slice %7 {offsets = [0, 8], sizes = [16, 8], strides = [1, 1]} : vector<16x32xbf16> to vector<16x8xbf16>
    %c1 = arith.constant 1 : index
    %c0_8 = arith.constant 0 : index
    %c0_9 = arith.constant 0 : index
    %13 = vector.load %arg4[%c1, %c0_8, %c0_9] : memref<4x16x8xbf16, #tpu.memory_space<vmem>>, vector<1x16x8xbf16>
    %14 = vector.shape_cast %13 : vector<1x16x8xbf16> to vector<16x8xbf16>
    %15 = vector.shape_cast %12 : vector<16x8xbf16> to vector<1x16x8xbf16>
    tpu.vector_store %arg4[%c1, %c0_8, %c0_9], %15 {strides = array<i32>} : memref<4x16x8xbf16, #tpu.memory_space<vmem>>, vector<1x16x8xbf16>,
    %16 = vector.extract_strided_slice %7 {offsets = [0, 16], sizes = [16, 8], strides = [1, 1]} : vector<16x32xbf16> to vector<16x8xbf16>
    %c2 = arith.constant 2 : index
    %c0_10 = arith.constant 0 : index
    %c0_11 = arith.constant 0 : index
    %17 = vector.load %arg4[%c2, %c0_10, %c0_11] : memref<4x16x8xbf16, #tpu.memory_space<vmem>>, vector<1x16x8xbf16>
    %18 = vector.shape_cast %17 : vector<1x16x8xbf16> to vector<16x8xbf16>
    %19 = vector.shape_cast %16 : vector<16x8xbf16> to vector<1x16x8xbf16>
    tpu.vector_store %arg4[%c2, %c0_10, %c0_11], %19 {strides = array<i32>} : memref<4x16x8xbf16, #tpu.memory_space<vmem>>, vector<1x16x8xbf16>,
    %20 = vector.extract_strided_slice %7 {offsets = [0, 24], sizes = [16, 8], strides = [1, 1]} : vector<16x32xbf16> to vector<16x8xbf16>
    %c3 = arith.constant 3 : index
    %c0_12 = arith.constant 0 : index
    %c0_13 = arith.constant 0 : index
    %21 = vector.load %arg4[%c3, %c0_12, %c0_13] : memref<4x16x8xbf16, #tpu.memory_space<vmem>>, vector<1x16x8xbf16>
    %22 = vector.shape_cast %21 : vector<1x16x8xbf16> to vector<16x8xbf16>
    %23 = vector.shape_cast %20 : vector<16x8xbf16> to vector<1x16x8xbf16>
    tpu.vector_store %arg4[%c3, %c0_12, %c0_13], %23 {strides = array<i32>} : memref<4x16x8xbf16, #tpu.memory_space<vmem>>, vector<1x16x8xbf16>,
    return
  }
  func.func @transform_0(%arg0: i32) -> (i32, i32) {
    %c0_i32 = arith.constant 0 : i32
    %c0_i32_0 = arith.constant 0 : i32
    return %arg0, %c0_i32 : i32, i32
  }
  func.func @transform_1(%arg0: i32) -> (i32, i32) {
    %c0_i32 = arith.constant 0 : i32
    %c0_i32_0 = arith.constant 0 : i32
    %c0_i32_1 = arith.constant 0 : i32
    return %c0_i32, %c0_i32_0 : i32, i32
  }
  func.func @transform_2(%arg0: i32) -> (i32, i32) {
    %c0_i32 = arith.constant 0 : i32
    %c0_i32_0 = arith.constant 0 : i32
    %c0_i32_1 = arith.constant 0 : i32
    return %c0_i32, %c0_i32_0 : i32, i32
  }
  func.func @transform_3(%arg0: i32) -> (i32, i32, i32) {
    %c0_i32 = arith.constant 0 : i32
    %c0_i32_0 = arith.constant 0 : i32
    %c0_i32_1 = arith.constant 0 : i32
    return %c0_i32, %arg0, %c0_i32_0 : i32, i32, i32
  }
}

</mosaic_0001>

<bundles_post_ra>
// kernel: tpu_custom_call.1
= control target key start
LH: loop header
LB: loop body
LE: loop exit
PB: predicated region body
PF: predicated region fallthrough
CT: control target
= control target key end

     0   :  { %8 = vsyncpa [#allocation3], 0  ;;  %s334_s0 = inlined_call_operand.hbm [shape: f32[16,32], index: 0, kind: input, shape index: {}]   ;;  %s335_s1 = inlined_call_operand.hbm [shape: bf16[32,32], index: 1, kind: input, shape index: {}]   ;;  %s336_s2 = inlined_call_operand.vmem [shape: f32[1,32], index: 2, kind: input, shape index: {}]   ;;  %s337_s3 = inlined_call_operand.vmem [shape: bf16[4,16,8], index: 3, kind: output, shape index: {}]  }
   0x1   :  { %9 = vsyncpa [#allocation5], 0  ;;  %s244_s12 = smov [#allocation2]   ;;  %s196_s16 = scalar_lea.hbm %s334_s0, 256 }
   0x2   :  { %s15_s13 = sshll.u32 %s244_s12, 4  ;;  %p197_p0 = scmp.ne.s32.totalorder %s334_s0, %s196_s16  ;;  %s16_s13 = int_to_ptr.vmem [resolvable:$true] %s15_s13 }
   0x3   :  { %p200_p1 = scmp.lt.u32.totalorder %s196_s16, %s334_s0 }
   0x5   :  { %p202_p2 = pnand %p200_p1, %p197_p0 }
   0x7   :  { %205 = shalt.err (!%p202_p2)
}
   0x8   :  { %s206_s21 = scalar_lea.vmem %s16_s13, 256  ;;  %p211_p4 = scmp.lt.s32.totalorder %s16_s13, %s16_s13 }
   0x9   :  { %p207_p3 = scmp.ne.s32.totalorder %s16_s13, %s206_s21  ;;  %p212_p5 = scmp.lt.s32.totalorder %s206_s21, %s206_s21 }
   0xb   :  { %p213_p6 = por %p212_p5, %p211_p4 }
   0xd   :  { %p214_p7 = pnand %p213_p6, %p207_p3 }
   0xf   :  { %217 = shalt.err (!%p214_p7)
}
  0x10   :  { %s245_s22 = smov 128   ;;  %s246_s23 = smov 8  }
  0x11   :  { %21 = dma.hbm_to_vmem [thread:$0]  %s334_s0, 256, %s16_s13, [#allocation3], %s245_s22, %s245_s22, %s246_s23  }
  0x12   :  { %s247_s26 = smov [#allocation4]   ;;  %s218_s30 = scalar_lea.hbm %s335_s1, 256 }
  0x13   :  { %s27_s27 = sshll.u32 %s247_s26, 4  ;;  %p219_p8 = scmp.ne.s32.totalorder %s335_s1, %s218_s30  ;;  %s28_s27 = int_to_ptr.vmem [resolvable:$true] %s27_s27 }
  0x14   :  { %p222_p9 = scmp.lt.u32.totalorder %s218_s30, %s335_s1 }
  0x16   :  { %p224_p10 = pnand %p222_p9, %p219_p8 }
  0x18   :  { %227 = shalt.err (!%p224_p10)
}
  0x19   :  { %s228_s8 = scalar_lea.vmem %s28_s27, 256  ;;  %p233_p12 = scmp.lt.s32.totalorder %s28_s27, %s28_s27 }
  0x1a   :  { %p229_p11 = scmp.ne.s32.totalorder %s28_s27, %s228_s8  ;;  %p234_p13 = scmp.lt.s32.totalorder %s228_s8, %s228_s8 }
  0x1c   :  { %p235_p0 = por %p234_p13, %p233_p12 }
  0x1e   :  { %p236_p1 = pnand %p235_p0, %p229_p11 }
  0x20   :  { %239 = shalt.err (!%p236_p1)
}
  0x21   :  { %s248_s0 = smov 64   ;;  %s249_s9 = smov 4  }
  0x22   :  { %33 = dma.hbm_to_vmem [thread:$0]  %s335_s1, 256, %s28_s27, [#allocation5], %s248_s0, %s248_s0, %s249_s9  }
  0x23   :  { %240 = dma.done.wait [#allocation3], 256  }
  0x24   :  { %241 = vsyncadd [#allocation3], 4294967040 }
  0x25   :  { %242 = dma.done.wait [#allocation5], 256  }
  0x26   :  { %243 = vsyncadd [#allocation5], 4294967040  ;;  %v250_v0 = vmov 0.0   ;;  %vm251_vm0 = vmmov 0   ;;  %v194_v1 = vld [vmem:[#allocation4] sm:$0xff]   ;;  %v195_v2 = vld [vmem:[#allocation4 + $0x8] sm:$0xff]  }
  0x27   :  { %175 = vmatprep.subr.bf16.mxu0 %v250_v0  ;;  %179 = vmatprep.mubr.msk.bf16.mxu0 %vm251_vm0, %v250_v0  ;;  %v43_v3 = vld [vmem:[#allocation2] sm:$0xff]  ;;  %v44_v4 = vld [vmem:[#allocation2 + $0x8] sm:$0xff]  ;;  %vm69_vm1 = vcmask 261120   ;;  %vm122_vm2 = vcmask 60416   ;;  %s252_s15 = smov 112   ;;  %s253_s16 = smov 120  }
  0x28   :  { %176 = vmatpush3.bf16.msra.mxu0 %v194_v1  ;;  %v45_v5 = vpack.c.bf16 %v44_v4, %v43_v3  ;;  %v158_v6 = vld [vmem:[%s336_s2] ss:$0 sm:$0xff]  ;;  %s254_s18 = smov 104  }
  0x29   :  { %177 = vmatprep.subr.bf16.mxu0 %v250_v0 }
  0x2c   :  { %178 = vmatpush3.bf16.msra.mxu0 %v195_v2 }
  0x2f   :  { %180 = vmatmul.mubr.msk.bf16.vlgmr.msra.gmra.mrb[0].mxu0 %vm69_vm1, %v45_v5 }
 0x102   :  { %v107_v7 = vpop.f32.mrb[0].mxu0 }
 0x103   :  { %v108_v8 = vadd.f32 %v158_v6, %v107_v7  ;;  %v181_v9 = vpop.f32.mrb[1].mxu0 }
 0x104   :  { %v110_v10 = vpop.f32.mrb[2].mxu0 }
 0x105   :  { %v170_v11 = vpack.c.bf16 %v108_v8, %v108_v8  ;;  %v111_v12 = vadd.f32 %v158_v6, %v110_v10  ;;  %v182_v13 = vpop.f32.mrb[3].mxu0 }
 0x107   :  { %123 = vst.msk [vmem:[%s337_s3] sm:$0xf] %vm122_vm2, %v170_v11  ;;  %v171_v14 = vpack.c.bf16 %v111_v12, %v111_v12  ;;  %134 = vrot.lane.b32.xlu1 %v170_v11, %s252_s15  ;;  %125 = vrot.lane.b32.xlu0 %v170_v11, %s253_s16 }
 0x109   :  { %124 = vst.msk [vmem:[%s337_s3 + $0x4] sm:$0xf] %vm122_vm2, %v171_v14 }
 0x10b   :  { %136 = vrot.lane.b32.xlu1 %v171_v14, %s252_s15  ;;  %127 = vrot.lane.b32.xlu0 %v171_v14, %s253_s16 }
 0x10f   :  { %145 = vrot.lane.b32.xlu1 %v171_v14, %s254_s18  ;;  %143 = vrot.lane.b32.xlu0 %v170_v11, %s254_s18 }
 0x179   :  { %v135_v15 = vpop.permute.xlu1 %134  ;;  %v126_v16 = vpop.permute.xlu0 %125 }
 0x17a   :  { %166 = vst.msk [vmem:[%s337_s3 + $0x10] sm:$0xf] %vm122_vm2, %v135_v15  ;;  %164 = vst.msk [vmem:[%s337_s3 + $0x8] sm:$0xf] %vm122_vm2, %v126_v16 }
 0x17d   :  { %v137_v17 = vpop.permute.xlu1 %136  ;;  %v128_v18 = vpop.permute.xlu0 %127 }
 0x17e   :  { %167 = vst.msk [vmem:[%s337_s3 + $0x14] sm:$0xf] %vm122_vm2, %v137_v17  ;;  %165 = vst.msk [vmem:[%s337_s3 + $0xc] sm:$0xf] %vm122_vm2, %v128_v18 }
 0x181   :  { %v146_v19 = vpop.permute.xlu1 %145  ;;  %v144_v20 = vpop.permute.xlu0 %143 }
 0x182   :  { %169 = vst.msk [vmem:[%s337_s3 + $0x1c] sm:$0xf] %vm122_vm2, %v146_v19  ;;  %168 = vst.msk [vmem:[%s337_s3 + $0x18] sm:$0xf] %vm122_vm2, %v144_v20 }
 0x183   :  { %156 = vsyncpa [#allocation3], 1 }
 0x184   :  { %157 = vsyncpa [#allocation5], 1 }

</bundles_post_ra>
